<compile_context>
chip_gen: v7x
topology: tpu7x:2x2x1
jax: 0.10.0
libtpu: 0.0.40
codegen_flags: <defaults>
</compile_context>

<pallas_src>
import math

import jax
import jax.numpy as jnp
from jax.experimental import pallas as pl
from jax.experimental.pallas import tpu as pltpu


def _round_up(n, m):
    return ((n + m - 1) // m) * m


def mlp_kernel(x_ref, w1_ref, b1_ref, w2_ref, b2_ref, w3_ref, b3_ref,
               w4_ref, b4_ref, o_ref):
    # fc1 + relu : bf16 MXU inputs, f32 accumulation, f32 elementwise math.
    h = jnp.dot(x_ref[...], w1_ref[...],
                preferred_element_type=jnp.float32) + b1_ref[...]
    h = jnp.maximum(h, 0.0)
    # fc2 + relu
    h = jnp.dot(h.astype(jnp.bfloat16), w2_ref[...],
                preferred_element_type=jnp.float32) + b2_ref[...]
    h = jnp.maximum(h, 0.0)
    # fc3 + relu (the second consecutive ReLU in the PyTorch forward is
    # idempotent, so it is folded into this one)
    h = jnp.dot(h.astype(jnp.bfloat16), w3_ref[...],
                preferred_element_type=jnp.float32) + b3_ref[...]
    h = jnp.maximum(h, 0.0)
    # fc4 (no activation); output columns are padded to a lane-dense slab.
    out = jnp.dot(h.astype(jnp.bfloat16), w4_ref[...],
                  preferred_element_type=jnp.float32) + b4_ref[...]
    o_ref[...] = out.astype(o_ref.dtype)


def custom_simple_net(x_nchw, params, *, block_m=256,
                      vmem_budget_bytes=48 * 1024 * 1024):
    """Forward pass of CustomSimpleNet as one fused Pallas kernel.

    x_nchw: (B, C, H, W) float32; flattened to (B, C*H*W) like torch.flatten(x, 1).
    params: dict with w1..w4 of shape (in, out) and b1..b4 of shape (1, out), f32.
    block_m: max batch tile height (256 targets v6e/v7x MXU height; use 128 on v5e).
    """
    B = x_nchw.shape[0]
    x = x_nchw.reshape(B, -1).astype(jnp.bfloat16)
    d_in = x.shape[1]

    # Weights in bf16 (MXU-native), biases kept in f32 (added post-accumulate).
    w1 = params["w1"].astype(jnp.bfloat16)
    w2 = params["w2"].astype(jnp.bfloat16)
    w3 = params["w3"].astype(jnp.bfloat16)
    b1 = params["b1"].astype(jnp.float32)
    b2 = params["b2"].astype(jnp.float32)
    b3 = params["b3"].astype(jnp.float32)
    h1, h2, h3 = w1.shape[1], w2.shape[1], w3.shape[1]

    # Lane-dense output: zero-pad fc4 columns to a multiple of 128.
    out_dim = params["w4"].shape[1]
    out_pad = _round_up(out_dim, 128)
    w4 = jnp.pad(params["w4"],
                 ((0, 0), (0, out_pad - out_dim))).astype(jnp.bfloat16)
    b4 = jnp.pad(params["b4"],
                 ((0, 0), (0, out_pad - out_dim))).astype(jnp.float32)

    # --- Choose a batch tile that keeps (resident weights + double-buffered
    # x / out tiles + f32 intermediates) inside the VMEM budget. ---
    weight_bytes = 2 * (w1.size + w2.size + w3.size + w4.size) \
        + 4 * (b1.size + b2.size + b3.size + b4.size)

    def tile_bytes(t):
        return (2 * t * d_in * 2          # double-buffered bf16 input tile
                + 2 * t * out_pad * 4     # double-buffered f32 output tile
                + t * (h1 + h2 + h3) * 4)  # f32 intermediates (upper bound)

    tm = _round_up(min(block_m, _round_up(B, 8)), 8)
    while tm > 8 and weight_bytes + tile_bytes(tm) > vmem_budget_bytes:
        tm = _round_up(tm // 2, 8)

    b_pad = _round_up(B, tm)
    if b_pad != B:
        x = jnp.pad(x, ((0, b_pad - B), (0, 0)))
    grid = (b_pad // tm,)

    vmem_limit = min(64 * 1024 * 1024,
                     max(32 * 1024 * 1024,
                         int(1.25 * (weight_bytes + tile_bytes(tm)))))

    def resident(arr):
        # Whole-array block with a constant index_map: DMA'd once, VMEM-resident.
        return pl.BlockSpec(arr.shape, lambda i: (0, 0))

    out_padded = pl.pallas_call(
        mlp_kernel,
        out_shape=jax.ShapeDtypeStruct((b_pad, out_pad), jnp.float32),
        grid_spec=pltpu.PrefetchScalarGridSpec(
            num_scalar_prefetch=0,
            grid=grid,
            in_specs=[
                pl.BlockSpec((tm, d_in), lambda i: (i, 0)),
                resident(w1), resident(b1),
                resident(w2), resident(b2),
                resident(w3), resident(b3),
                resident(w4), resident(b4),
            ],
            out_specs=pl.BlockSpec((tm, out_pad), lambda i: (i, 0)),
        ),
        compiler_params=pltpu.CompilerParams(
            dimension_semantics=("parallel",),
            vmem_limit_bytes=vmem_limit),
    )(x, w1, b1, w2, b2, w3, b3, w4, b4)

    return out_padded[:B, :out_dim]


def init_linear(key, fan_in, fan_out):
    """Deterministic PyTorch-style nn.Linear init; returns W as (in, out)."""
    kw, kb = jax.random.split(key)
    bound = 1.0 / math.sqrt(fan_in)
    w = jax.random.uniform(kw, (fan_in, fan_out), jnp.float32, -bound, bound)
    b = jax.random.uniform(kb, (1, fan_out), jnp.float32, -bound, bound)
    return w, b


def reference_forward(x_nchw, params):
    """Pure-JAX reference with matching bf16-matmul / f32-accumulate numerics."""
    bf16 = jnp.bfloat16
    x = x_nchw.reshape(x_nchw.shape[0], -1)

    def lin(h, w, b):
        return jnp.dot(h.astype(bf16), w.astype(bf16),
                       preferred_element_type=jnp.float32) + b

    h = jnp.maximum(lin(x, params["w1"], params["b1"]), 0.0)
    h = jnp.maximum(lin(h, params["w2"], params["b2"]), 0.0)
    h = jnp.maximum(lin(h, params["w3"], params["b3"]), 0.0)
    h = jnp.maximum(h, 0.0)  # faithful to the PyTorch forward (no-op)
    return lin(h, params["w4"], params["b4"])


if __name__ == "__main__":
    # Small shapes consistent with the module structure:
    # batch=2, input image 3x16x16 -> input_dim=768, hidden=[128, 64, 128], out=10.
    B, C, H, W = 2, 3, 16, 16
    input_dim = C * H * W
    hidden_dims = [128, 64, 128]
    output_dim = 10

    key = jax.random.PRNGKey(0)
    kx, k1, k2, k3, k4 = jax.random.split(key, 5)

    x = jax.random.normal(kx, (B, C, H, W), jnp.float32)

    w1, b1 = init_linear(k1, input_dim, hidden_dims[0])
    w2, b2 = init_linear(k2, hidden_dims[0], hidden_dims[1])
    w3, b3 = init_linear(k3, hidden_dims[1], hidden_dims[2])
    w4, b4 = init_linear(k4, hidden_dims[2], output_dim)
    params = {"w1": w1, "b1": b1, "w2": w2, "b2": b2,
              "w3": w3, "b3": b3, "w4": w4, "b4": b4}

    out = custom_simple_net(x, params)
    out = jax.block_until_ready(out)

    ref = reference_forward(x, params)
    assert out.shape == (B, output_dim)
    assert jnp.allclose(out, ref, atol=1e-2, rtol=1e-2)

    print("KERNEL_OK")
</pallas_src>

<mosaic_0001>
module attributes {stable_mosaic.version = 11 : i64} {
  func.func @mlp_kernel(%arg0: i32, %arg1: memref<8x768xbf16, #tpu.memory_space<vmem>>, %arg2: memref<768x128xbf16, #tpu.memory_space<vmem>>, %arg3: memref<1x128xf32, #tpu.memory_space<vmem>>, %arg4: memref<128x64xbf16, #tpu.memory_space<vmem>>, %arg5: memref<1x64xf32, #tpu.memory_space<vmem>>, %arg6: memref<64x128xbf16, #tpu.memory_space<vmem>>, %arg7: memref<1x128xf32, #tpu.memory_space<vmem>>, %arg8: memref<128x128xbf16, #tpu.memory_space<vmem>>, %arg9: memref<1x128xf32, #tpu.memory_space<vmem>>, %arg10: memref<8x128xf32, #tpu.memory_space<vmem>>) attributes {dimension_semantics = [#tpu.dimension_semantics<parallel>], iteration_bounds = array<i64: 1>, scalar_prefetch = 0 : i64, scratch_operands = 0 : i64, tpu.core_type = #tpu.core_type<tc>, window_params = [{transform_indices = @transform_0, window_bounds = array<i64: 8, 768>}, {pipeline_mode = #tpu.pipeline_mode<synchronous>, transform_indices = @transform_1, window_bounds = array<i64: 768, 128>}, {pipeline_mode = #tpu.pipeline_mode<synchronous>, transform_indices = @transform_2, window_bounds = array<i64: 1, 128>}, {pipeline_mode = #tpu.pipeline_mode<synchronous>, transform_indices = @transform_3, window_bounds = array<i64: 128, 64>}, {pipeline_mode = #tpu.pipeline_mode<synchronous>, transform_indices = @transform_4, window_bounds = array<i64: 1, 64>}, {pipeline_mode = #tpu.pipeline_mode<synchronous>, transform_indices = @transform_5, window_bounds = array<i64: 64, 128>}, {pipeline_mode = #tpu.pipeline_mode<synchronous>, transform_indices = @transform_6, window_bounds = array<i64: 1, 128>}, {pipeline_mode = #tpu.pipeline_mode<synchronous>, transform_indices = @transform_7, window_bounds = array<i64: 128, 128>}, {pipeline_mode = #tpu.pipeline_mode<synchronous>, transform_indices = @transform_8, window_bounds = array<i64: 1, 128>}, {transform_indices = @transform_9, window_bounds = array<i64: 8, 128>}]} {
    %c0 = arith.constant 0 : index
    %c0_0 = arith.constant 0 : index
    %0 = vector.load %arg1[%c0, %c0_0] : memref<8x768xbf16, #tpu.memory_space<vmem>>, vector<8x768xbf16>
    %c0_1 = arith.constant 0 : index
    %c0_2 = arith.constant 0 : index
    %1 = vector.load %arg2[%c0_1, %c0_2] : memref<768x128xbf16, #tpu.memory_space<vmem>>, vector<768x128xbf16>
    %cst = arith.constant dense<0.000000e+00> : vector<8x128xf32>
    %2 = tpu.matmul %0, %1, %cst {dimension_numbers = #tpu.dot_dimension_numbers<[1], [0], [0], [1], [0, 0, 1, 1], [], []>} : vector<8x768xbf16>, vector<768x128xbf16>, vector<8x128xf32> -> vector<8x128xf32>
    %c0_3 = arith.constant 0 : index
    %c0_4 = arith.constant 0 : index
    %3 = vector.load %arg3[%c0_3, %c0_4] : memref<1x128xf32, #tpu.memory_space<vmem>>, vector<1x128xf32>
    %4 = vector.broadcast %3 : vector<1x128xf32> to vector<8x128xf32>
    %5 = arith.addf %2, %4 : vector<8x128xf32>
    %cst_5 = arith.constant 0.000000e+00 : f32
    %6 = vector.broadcast %cst_5 : f32 to vector<8x128xf32>
    %7 = arith.maximumf %5, %6 : vector<8x128xf32>
    %8 = arith.truncf %7 : vector<8x128xf32> to vector<8x128xbf16>
    %c0_6 = arith.constant 0 : index
    %c0_7 = arith.constant 0 : index
    %9 = vector.load %arg4[%c0_6, %c0_7] : memref<128x64xbf16, #tpu.memory_space<vmem>>, vector<128x64xbf16>
    %cst_8 = arith.constant dense<0.000000e+00> : vector<8x64xf32>
    %10 = tpu.matmul %8, %9, %cst_8 {dimension_numbers = #tpu.dot_dimension_numbers<[1], [0], [0], [1], [0, 0, 1, 1], [], []>} : vector<8x128xbf16>, vector<128x64xbf16>, vector<8x64xf32> -> vector<8x64xf32>
    %c0_9 = arith.constant 0 : index
    %c0_10 = arith.constant 0 : index
    %11 = vector.load %arg5[%c0_9, %c0_10] : memref<1x64xf32, #tpu.memory_space<vmem>>, vector<1x64xf32>
    %12 = vector.broadcast %11 : vector<1x64xf32> to vector<8x64xf32>
    %13 = arith.addf %10, %12 : vector<8x64xf32>
    %cst_11 = arith.constant 0.000000e+00 : f32
    %14 = vector.broadcast %cst_11 : f32 to vector<8x64xf32>
    %15 = arith.maximumf %13, %14 : vector<8x64xf32>
    %16 = arith.truncf %15 : vector<8x64xf32> to vector<8x64xbf16>
    %c0_12 = arith.constant 0 : index
    %c0_13 = arith.constant 0 : index
    %17 = vector.load %arg6[%c0_12, %c0_13] : memref<64x128xbf16, #tpu.memory_space<vmem>>, vector<64x128xbf16>
    %cst_14 = arith.constant dense<0.000000e+00> : vector<8x128xf32>
    %18 = tpu.matmul %16, %17, %cst_14 {dimension_numbers = #tpu.dot_dimension_numbers<[1], [0], [0], [1], [0, 0, 1, 1], [], []>} : vector<8x64xbf16>, vector<64x128xbf16>, vector<8x128xf32> -> vector<8x128xf32>
    %c0_15 = arith.constant 0 : index
    %c0_16 = arith.constant 0 : index
    %19 = vector.load %arg7[%c0_15, %c0_16] : memref<1x128xf32, #tpu.memory_space<vmem>>, vector<1x128xf32>
    %20 = vector.broadcast %19 : vector<1x128xf32> to vector<8x128xf32>
    %21 = arith.addf %18, %20 : vector<8x128xf32>
    %cst_17 = arith.constant 0.000000e+00 : f32
    %22 = vector.broadcast %cst_17 : f32 to vector<8x128xf32>
    %23 = arith.maximumf %21, %22 : vector<8x128xf32>
    %24 = arith.truncf %23 : vector<8x128xf32> to vector<8x128xbf16>
    %c0_18 = arith.constant 0 : index
    %c0_19 = arith.constant 0 : index
    %25 = vector.load %arg8[%c0_18, %c0_19] : memref<128x128xbf16, #tpu.memory_space<vmem>>, vector<128x128xbf16>
    %cst_20 = arith.constant dense<0.000000e+00> : vector<8x128xf32>
    %26 = tpu.matmul %24, %25, %cst_20 {dimension_numbers = #tpu.dot_dimension_numbers<[1], [0], [0], [1], [0, 0, 1, 1], [], []>} : vector<8x128xbf16>, vector<128x128xbf16>, vector<8x128xf32> -> vector<8x128xf32>
    %c0_21 = arith.constant 0 : index
    %c0_22 = arith.constant 0 : index
    %27 = vector.load %arg9[%c0_21, %c0_22] : memref<1x128xf32, #tpu.memory_space<vmem>>, vector<1x128xf32>
    %28 = vector.broadcast %27 : vector<1x128xf32> to vector<8x128xf32>
    %29 = arith.addf %26, %28 : vector<8x128xf32>
    %c0_23 = arith.constant 0 : index
    %c0_24 = arith.constant 0 : index
    %30 = vector.load %arg10[%c0_23, %c0_24] : memref<8x128xf32, #tpu.memory_space<vmem>>, vector<8x128xf32>
    tpu.vector_store %arg10[%c0_23, %c0_24], %29 {strides = array<i32>} : memref<8x128xf32, #tpu.memory_space<vmem>>, vector<8x128xf32>,
    return
  }
  func.func @transform_0(%arg0: i32) -> (i32, i32) {
    %c0_i32 = arith.constant 0 : i32
    %c0_i32_0 = arith.constant 0 : i32
    return %arg0, %c0_i32 : i32, i32
  }
  func.func @transform_1(%arg0: i32) -> (i32, i32) {
    %c0_i32 = arith.constant 0 : i32
    %c0_i32_0 = arith.constant 0 : i32
    %c0_i32_1 = arith.constant 0 : i32
    return %c0_i32, %c0_i32_0 : i32, i32
  }
  func.func @transform_2(%arg0: i32) -> (i32, i32) {
    %c0_i32 = arith.constant 0 : i32
    %c0_i32_0 = arith.constant 0 : i32
    %c0_i32_1 = arith.constant 0 : i32
    return %c0_i32, %c0_i32_0 : i32, i32
  }
  func.func @transform_3(%arg0: i32) -> (i32, i32) {
    %c0_i32 = arith.constant 0 : i32
    %c0_i32_0 = arith.constant 0 : i32
    %c0_i32_1 = arith.constant 0 : i32
    return %c0_i32, %c0_i32_0 : i32, i32
  }
  func.func @transform_4(%arg0: i32) -> (i32, i32) {
    %c0_i32 = arith.constant 0 : i32
    %c0_i32_0 = arith.constant 0 : i32
    %c0_i32_1 = arith.constant 0 : i32
    return %c0_i32, %c0_i32_0 : i32, i32
  }
  func.func @transform_5(%arg0: i32) -> (i32, i32) {
    %c0_i32 = arith.constant 0 : i32
    %c0_i32_0 = arith.constant 0 : i32
    %c0_i32_1 = arith.constant 0 : i32
    return %c0_i32, %c0_i32_0 : i32, i32
  }
  func.func @transform_6(%arg0: i32) -> (i32, i32) {
    %c0_i32 = arith.constant 0 : i32
    %c0_i32_0 = arith.constant 0 : i32
    %c0_i32_1 = arith.constant 0 : i32
    return %c0_i32, %c0_i32_0 : i32, i32
  }
  func.func @transform_7(%arg0: i32) -> (i32, i32) {
    %c0_i32 = arith.constant 0 : i32
    %c0_i32_0 = arith.constant 0 : i32
    %c0_i32_1 = arith.constant 0 : i32
    return %c0_i32, %c0_i32_0 : i32, i32
  }
  func.func @transform_8(%arg0: i32) -> (i32, i32) {
    %c0_i32 = arith.constant 0 : i32
    %c0_i32_0 = arith.constant 0 : i32
    %c0_i32_1 = arith.constant 0 : i32
    return %c0_i32, %c0_i32_0 : i32, i32
  }
  func.func @transform_9(%arg0: i32) -> (i32, i32) {
    %c0_i32 = arith.constant 0 : i32
    %c0_i32_0 = arith.constant 0 : i32
    return %arg0, %c0_i32 : i32, i32
  }
}

</mosaic_0001>

<bundles_post_ra>
// kernel: tpu_custom_call.1
= control target key start
LH: loop header
LB: loop body
LE: loop exit
PB: predicated region body
PF: predicated region fallthrough
CT: control target
= control target key end

     0   :  { %14 = vsyncpa [#allocation3], 0  ;;  %s1493_s0 = inlined_call_operand.vmem [shape: bf16[8,768], index: 0, kind: input, shape index: {}]   ;;  %s1494_s1 = inlined_call_operand.hbm [shape: bf16[768,128], index: 1, kind: input, shape index: {}]   ;;  %s1495_s2 = inlined_call_operand.vmem [shape: f32[1,128], index: 2, kind: input, shape index: {}]   ;;  %s1496_s3 = inlined_call_operand.vmem [shape: bf16[128,64], index: 3, kind: input, shape index: {}]   ;;  %s1497_s4 = inlined_call_operand.vmem [shape: f32[1,64], index: 4, kind: input, shape index: {}]   ;;  %s1498_s5 = inlined_call_operand.vmem [shape: bf16[64,128], index: 5, kind: input, shape index: {}]   ;;  %s1499_s6 = inlined_call_operand.hbm [shape: f32[1,128], index: 6, kind: input, shape index: {}]   ;;  %s1500_s7 = inlined_call_operand.vmem [shape: bf16[128,128], index: 7, kind: input, shape index: {}]   ;;  %s1501_s8 = inlined_call_operand.vmem [shape: f32[1,128], index: 8, kind: input, shape index: {}]   ;;  %s1502_s9 = inlined_call_operand.hbm [shape: f32[8,128], index: 9, kind: output, shape index: {}]  }
   0x1   :  { %15 = vsyncpa [#allocation6], 0 }
   0x2   :  { %16 = vsyncpa [#allocation4], 0  ;;  %s1296_s30 = smov [#allocation2]   ;;  %s1224_s13 = scalar_lea.hbm %s1494_s1, 6144 }
   0x3   :  { %s24_s10 = sshll.u32 %s1296_s30, 4  ;;  %p1225_p0 = scmp.ne.s32.totalorder %s1494_s1, %s1224_s13  ;;  %s25_s10 = int_to_ptr.vmem [resolvable:$true] %s24_s10 }
   0x4   :  { %p1228_p1 = scmp.lt.u32.totalorder %s1224_s13, %s1494_s1 }
   0x6   :  { %p1230_p2 = pnand %p1228_p1, %p1225_p0 }
   0x8   :  { %1233 = shalt.err (!%p1230_p2)
}
   0x9   :  { %s1234_s18 = scalar_lea.vmem %s25_s10, 6144  ;;  %p1239_p4 = scmp.lt.s32.totalorder %s25_s10, %s25_s10 }
   0xa   :  { %p1235_p3 = scmp.ne.s32.totalorder %s25_s10, %s1234_s18  ;;  %p1240_p5 = scmp.lt.s32.totalorder %s1234_s18, %s1234_s18 }
   0xc   :  { %p1241_p6 = por %p1240_p5, %p1239_p4 }
   0xe   :  { %p1242_p7 = pnand %p1241_p6, %p1235_p3 }
  0x10   :  { %1245 = shalt.err (!%p1242_p7)
}
  0x11   :  { %s1297_s19 = smov 64   ;;  %s1298_s20 = smov 4  }
  0x12   :  { %30 = dma.hbm_to_vmem [thread:$0]  %s1494_s1, 6144, %s25_s10, [#allocation3], %s1297_s19, %s1297_s19, %s1298_s20  }
  0x13   :  { %s1299_s23 = smov [#allocation5]   ;;  %s1246_s27 = scalar_lea.hbm %s1499_s6, 16 }
  0x14   :  { %s45_s24 = sshll.u32 %s1299_s23, 4  ;;  %p1247_p8 = scmp.ne.s32.totalorder %s1499_s6, %s1246_s27  ;;  %s46_s24 = int_to_ptr.vmem [resolvable:$true] %s45_s24 }
  0x15   :  { %p1250_p9 = scmp.lt.u32.totalorder %s1246_s27, %s1499_s6 }
  0x17   :  { %p1252_p10 = pnand %p1250_p9, %p1247_p8 }
  0x19   :  { %1255 = shalt.err (!%p1252_p10)
}
  0x1a   :  { %s1256_s12 = scalar_lea.vmem %s46_s24, 16  ;;  %s1260_s1 = scalar_lea.vmem %s46_s24, 32 }
  0x1b   :  { %p1257_p11 = scmp.ne.s32.totalorder %s46_s24, %s1256_s12  ;;  %p1261_p12 = scmp.lt.s32.totalorder %s46_s24, %s46_s24 }
  0x1c   :  { %p1262_p13 = scmp.lt.s32.totalorder %s1260_s1, %s1256_s12 }
  0x1e   :  { %p1263_p0 = por %p1262_p13, %p1261_p12 }
  0x20   :  { %p1264_p1 = pnand %p1263_p0, %p1257_p11 }
  0x22   :  { %1267 = shalt.err (!%p1264_p1)
}
  0x23   :  { %48 = dma.hbm_to_vmem [thread:$0]  %s1499_s6, 16, %s46_s24, [#allocation6]  }
  0x24   :  { %1290 = dma.done.wait [#allocation3], 6144  }
  0x25   :  { %1291 = vsyncadd [#allocation3], 4294961152 }
  0x26   :  { %1292 = dma.done.wait [#allocation6], 16  }
  0x27   :  { %1293 = vsyncadd [#allocation6], 4294967280  ;;  %v1150_v0 = vld [vmem:[#allocation2 + $0x40] sm:$0xff]   ;;  %v1154_v4 = vld [vmem:[#allocation2 + $0x48] sm:$0xff]   ;;  %v1300_v58 = vmov 0.0   ;;  %vm1301_vm0 = vmmov 0  }
  0x28   :  { %v1151_v1 = vld [vmem:[#allocation2] sm:$0xff]   ;;  %1002 = vmatprep.subr.bf16.mxu0 %v1150_v0  ;;  %v1155_v5 = vld [vmem:[#allocation2 + $0x8] sm:$0xff]   ;;  %v1158_v8 = vld [vmem:[#allocation2 + $0x50] sm:$0xff]   ;;  %vm749_vm1 = vcmask 523264   ;;  %s1302_s6 = smov [#allocation7]  }
  0x29   :  { %v1152_v2 = vld [vmem:[#allocation2 + $0xc0] sm:$0xff]   ;;  %1003 = vmatpush3.bf16.msra.mxu0 %v1151_v1  ;;  %v1156_v6 = vld [vmem:[#allocation2 + $0xc8] sm:$0xff]   ;;  %v1159_v9 = vld [vmem:[#allocation2 + $0x10] sm:$0xff]   ;;  %s913_s14 = sshll.u32 %s1302_s6, 4  ;;  %s914_s14 = int_to_ptr.vmem [resolvable:$true] %s913_s14 }
  0x2a   :  { %v1153_v3 = vld [vmem:[#allocation2 + $0x80] sm:$0xff]   ;;  %1024 = vmatprep.subr.bf16.mxu1 %v1152_v2  ;;  %1004 = vmatprep.subr.bf16.mxu0 %v1154_v4  ;;  %v1157_v7 = vld [vmem:[#allocation2 + $0x88] sm:$0xff]   ;;  %v1160_v10 = vld [vmem:[#allocation2 + $0xd0] sm:$0xff]   ;;  %p1273_p3 = scmp.lt.s32.totalorder %s914_s14, %s914_s14 }
  0x2b   :  { %1025 = vmatpush3.bf16.msra.mxu1 %v1153_v3  ;;  %v1161_v11 = vld [vmem:[#allocation2 + $0x90] sm:$0xff]   ;;  %v1162_v12 = vld [vmem:[#allocation2 + $0x58] sm:$0xff]   ;;  %v1166_v16 = vld [vmem:[#allocation2 + $0x60] sm:$0xff]  }
  0x2c   :  { %1026 = vmatprep.subr.bf16.mxu1 %v1156_v6  ;;  %v1163_v13 = vld [vmem:[#allocation2 + $0x18] sm:$0xff]   ;;  %v1167_v17 = vld [vmem:[#allocation2 + $0x20] sm:$0xff]   ;;  %v1170_v20 = vld [vmem:[#allocation2 + $0x68] sm:$0xff]  }
  0x2d   :  { %1005 = vmatpush3.bf16.msra.mxu0 %v1155_v5  ;;  %v1164_v14 = vld [vmem:[#allocation2 + $0xd8] sm:$0xff]   ;;  %v1168_v18 = vld [vmem:[#allocation2 + $0xe0] sm:$0xff]   ;;  %v1171_v21 = vld [vmem:[#allocation2 + $0x28] sm:$0xff]  }
  0x2e   :  { %1006 = vmatprep.subr.bf16.mxu0 %v1158_v8  ;;  %v1165_v15 = vld [vmem:[#allocation2 + $0x98] sm:$0xff]   ;;  %v1169_v19 = vld [vmem:[#allocation2 + $0xa0] sm:$0xff]   ;;  %v1172_v22 = vld [vmem:[#allocation2 + $0xe8] sm:$0xff]  }
  0x2f   :  { %1027 = vmatpush3.bf16.msra.mxu1 %v1157_v7  ;;  %v1173_v23 = vld [vmem:[#allocation2 + $0xa8] sm:$0xff]   ;;  %v1174_v24 = vld [vmem:[#allocation2 + $0x70] sm:$0xff]   ;;  %v1178_v28 = vld [vmem:[#allocation2 + $0x78] sm:$0xff]  }
  0x30   :  { %1028 = vmatprep.subr.bf16.mxu1 %v1160_v10  ;;  %v1175_v25 = vld [vmem:[#allocation2 + $0x30] sm:$0xff]   ;;  %v1179_v29 = vld [vmem:[#allocation2 + $0x38] sm:$0xff]   ;;  %v60_v31 = vld [vmem:[%s1493_s0] sm:$0xff] }
  0x31   :  { %1007 = vmatpush3.bf16.msra.mxu0 %v1159_v9  ;;  %v1176_v26 = vld [vmem:[#allocation2 + $0xf0] sm:$0xff]   ;;  %v1180_v30 = vld [vmem:[#allocation2 + $0xf8] sm:$0xff]   ;;  %v924_v32 = vcombine.low %v60_v31, %v60_v31  ;;  %v925_v33 = vcombine.high %v60_v31, %v60_v31  ;;  %v1184_v35 = vld [vmem:[#allocation2 + $0x140] sm:$0xff]  }
  0x32   :  { %1008 = vmatprep.subr.bf16.mxu0 %v1162_v12  ;;  %v1177_v27 = vld [vmem:[#allocation2 + $0xb0] sm:$0xff]   ;;  %v1183_v34 = vld [vmem:[#allocation2 + $0xb8] sm:$0xff]   ;;  %v61_v36 = vld [vmem:[%s1493_s0 + $0x8] sm:$0xff] }
  0x33   :  { %1029 = vmatpush3.bf16.msra.mxu1 %v1161_v11  ;;  %507 = vmatprep.mubr.bf16.mxu0 %v925_v33  ;;  %v926_v37 = vcombine.low %v61_v36, %v61_v36  ;;  %v927_v38 = vcombine.high %v61_v36, %v61_v36  ;;  %v1187_v39 = vld [vmem:[#allocation2 + $0x100] sm:$0xff]   ;;  %v1188_v40 = vld [vmem:[#allocation2 + $0x148] sm:$0xff]   ;;  %v1190_v42 = vld [vmem:[#allocation2 + $0x150] sm:$0xff]  }
  0x34   :  { %1030 = vmatprep.subr.bf16.mxu1 %v1164_v14  ;;  %v1189_v41 = vld [vmem:[#allocation2 + $0x108] sm:$0xff]   ;;  %v1191_v43 = vld [vmem:[#allocation2 + $0x110] sm:$0xff]   ;;  %v1192_v44 = vld [vmem:[#allocation2 + $0x158] sm:$0xff]  }
  0x35   :  { %1009 = vmatpush3.bf16.msra.mxu0 %v1163_v13  ;;  %547 = vmatprep.mubr.bf16.mxu1 %v927_v38  ;;  %v1193_v45 = vld [vmem:[#allocation2 + $0x118] sm:$0xff]   ;;  %v1194_v46 = vld [vmem:[#allocation2 + $0x160] sm:$0xff]   ;;  %v1196_v48 = vld [vmem:[#allocation2 + $0x168] sm:$0xff]  }
  0x36   :  { %1010 = vmatprep.subr.bf16.mxu0 %v1166_v16  ;;  %v1195_v47 = vld [vmem:[#allocation2 + $0x120] sm:$0xff]   ;;  %v62_v49 = vld [vmem:[%s1493_s0 + $0x10] sm:$0xff]  ;;  %v1197_v51 = vld [vmem:[#allocation2 + $0x128] sm:$0xff]  }
  0x37   :  { %1031 = vmatpush3.bf16.msra.mxu1 %v1165_v15  ;;  %v929_v50 = vcombine.high %v62_v49, %v62_v49  ;;  %v1198_v52 = vld [vmem:[#allocation2 + $0x170] sm:$0xff]   ;;  %v1200_v54 = vld [vmem:[#allocation2 + $0x178] sm:$0xff]   ;;  %v928_v56 = vcombine.low %v62_v49, %v62_v49  ;;  %v1204_v57 = vld [vmem:[%s1496_s3] sm:$0xff]  }
  0x38   :  { %1032 = vmatprep.subr.bf16.mxu1 %v1168_v18  ;;  %v1199_v53 = vld [vmem:[#allocation2 + $0x130] sm:$0xff]   ;;  %v1201_v55 = vld [vmem:[#allocation2 + $0x138] sm:$0xff]   ;;  %v1205_v59 = vld [vmem:[%s1496_s3 + $0x8] sm:$0xff]  }
  0x39   :  { %1011 = vmatpush3.bf16.msra.mxu0 %v1167_v17  ;;  %v1206_v60 = vld [vmem:[%s1496_s3 + $0x10] sm:$0xff]   ;;  %v1207_v61 = vld [vmem:[%s1496_s3 + $0x18] sm:$0xff]   ;;  %v1208_v62 = vld [vmem:[%s1496_s3 + $0x20] sm:$0xff]  }
  0x3a   :  { %1012 = vmatprep.subr.bf16.mxu0 %v1170_v20  ;;  %v1209_v63 = vld [vmem:[%s1496_s3 + $0x28] sm:$0xff]   ;;  %v1210_v0 = vld [vmem:[%s1496_s3 + $0x30] sm:$0xff]   ;;  %v1211_v1 = vld [vmem:[%s1496_s3 + $0x38] sm:$0xff]  }
  0x3b   :  { %1033 = vmatpush3.bf16.msra.mxu1 %v1169_v19  ;;  %v1212_v2 = vld [vmem:[%s1498_s5] sm:$0xff]   ;;  %v1213_v3 = vld [vmem:[%s1498_s5 + $0x8] sm:$0xff]  }
  0x3c   :  { %1034 = vmatprep.subr.bf16.mxu1 %v1172_v22  ;;  %v923_v5 = vld [vmem:[%s1495_s2] ss:$0 sm:$0xff] }
  0x3d   :  { %1013 = vmatpush3.bf16.msra.mxu0 %v1171_v21  ;;  %v1220_v31 = vld [vmem:[%s1500_s7 + $0x20] sm:$0xff]  }
  0x3e   :  { %1014 = vmatprep.subr.bf16.mxu0 %v1174_v24  ;;  %v978_v33 = vld [vmem:[%s1497_s4] ss:$0 sm:$0xff] }
  0x3f   :  { %1035 = vmatpush3.bf16.msra.mxu1 %v1173_v23 }
  0x40   :  { %1036 = vmatprep.subr.bf16.mxu1 %v1176_v26  ;;  %v1215_v26 = vld [vmem:[%s1498_s5 + $0x18] sm:$0xff]  }
  0x41   :  { %1015 = vmatpush3.bf16.msra.mxu0 %v1175_v25  ;;  %v1214_v25 = vld [vmem:[%s1498_s5 + $0x10] sm:$0xff]  }
  0x42   :  { %1016 = vmatprep.subr.bf16.mxu0 %v1178_v28  ;;  %v1217_v28 = vld [vmem:[%s1500_s7 + $0x8] sm:$0xff]  }
  0x43   :  { %1037 = vmatpush3.bf16.msra.mxu1 %v1177_v27  ;;  %v1216_v27 = vld [vmem:[%s1500_s7] sm:$0xff]  }
  0x44   :  { %1038 = vmatprep.subr.bf16.mxu1 %v1180_v30  ;;  %v1219_v30 = vld [vmem:[%s1500_s7 + $0x18] sm:$0xff]  }
  0x45   :  { %1017 = vmatpush3.bf16.msra.mxu0 %v1179_v29  ;;  %v1218_v29 = vld [vmem:[%s1500_s7 + $0x10] sm:$0xff]  }
  0x46   :  { %1046 = vmatprep.subr.bf16.mxu0 %v1184_v35 }
  0x47   :  { %1039 = vmatpush3.bf16.msra.mxu1 %v1183_v34 }
  0x48   :  { %508 = vmatmul.mubr.bf16.vlgmr.msra.gmra.mrb[0].mxu0 %v924_v32  ;;  %1091 = vmatprep.subr.bf16.mxu1 %v1300_v58  ;;  %v1221_v32 = vld [vmem:[%s1500_s7 + $0x28] sm:$0xff]  }
  0x49   :  { %1047 = vmatpush3.bf16.msra.mxu0 %v1187_v39  ;;  %587 = vmatprep.mubr.bf16.mxu0 %v929_v50 }
  0x4a   :  { %548 = vmatmul.mubr.bf16.vlgmr.msra.gmra.mrb[0].mxu1 %v926_v37  ;;  %1048 = vmatprep.subr.bf16.mxu0 %v1188_v40 }
  0x4b   :  { %1092 = vmatpush3.bf16.msra.mxu1 %v1204_v57  ;;  %1107 = vmatprep.mubr.msk.bf16.mxu1 %vm1301_vm0, %v1300_v58 }
  0x4c   :  { %1093 = vmatprep.subr.bf16.mxu1 %v1300_v58 }
  0x4d   :  { %1049 = vmatpush3.bf16.msra.mxu0 %v1189_v41  ;;  %v1222_v41 = vld [vmem:[%s1500_s7 + $0x30] sm:$0xff]  }
  0x4e   :  { %1050 = vmatprep.subr.bf16.mxu0 %v1190_v42  ;;  %v1223_v42 = vld [vmem:[%s1500_s7 + $0x38] sm:$0xff]   ;;  %s1268_s7 = scalar_lea.vmem %s914_s14, 128 }
  0x4f   :  { %1094 = vmatpush3.bf16.msra.mxu1 %v1205_v59  ;;  %p1269_p2 = scmp.ne.s32.totalorder %s914_s14, %s1268_s7  ;;  %p1274_p4 = scmp.lt.s32.totalorder %s1268_s7, %s1268_s7 }
  0x50   :  { %1095 = vmatprep.subr.bf16.mxu1 %v1300_v58 }
  0x51   :  { %1051 = vmatpush3.bf16.msra.mxu0 %v1191_v43  ;;  %v987_v43 = vld [vmem:[#allocation5] ss:$0 sm:$0xff]  ;;  %p1275_p5 = por %p1274_p4, %p1273_p3 }
  0x52   :  { %1052 = vmatprep.subr.bf16.mxu0 %v1192_v44 }
  0x53   :  { %1096 = vmatpush3.bf16.msra.mxu1 %v1206_v60  ;;  %p1276_p6 = pnand %p1275_p5, %p1269_p2 }
  0x54   :  { %1097 = vmatprep.subr.bf16.mxu1 %v1300_v58 }
  0x55   :  { %1053 = vmatpush3.bf16.msra.mxu0 %v1193_v45 }
  0x56   :  { %1054 = vmatprep.subr.bf16.mxu0 %v1194_v46 }
  0x57   :  { %1098 = vmatpush3.bf16.msra.mxu1 %v1207_v61 }
  0x58   :  { %1099 = vmatprep.subr.bf16.mxu1 %v1300_v58 }
  0x59   :  { %1055 = vmatpush3.bf16.msra.mxu0 %v1195_v47 }
  0x5a   :  { %1056 = vmatprep.subr.bf16.mxu0 %v1196_v48 }
  0x5b   :  { %1100 = vmatpush3.bf16.msra.mxu1 %v1208_v62 }
  0x5c   :  { %1101 = vmatprep.subr.bf16.mxu1 %v1300_v58 }
  0x5d   :  { %1057 = vmatpush3.bf16.msra.mxu0 %v1197_v51  ;;  %v993_v51 = vld [vmem:[%s1501_s8] ss:$0 sm:$0xff] }
  0x5e   :  { %1058 = vmatprep.subr.bf16.mxu0 %v1198_v52 }
  0x5f   :  { %1102 = vmatpush3.bf16.msra.mxu1 %v1209_v63 }
  0x60   :  { %1103 = vmatprep.subr.bf16.mxu1 %v1300_v58 }
  0x61   :  { %1059 = vmatpush3.bf16.msra.mxu0 %v1199_v53 }
  0x62   :  { %1060 = vmatprep.subr.bf16.mxu0 %v1200_v54 }
  0x63   :  { %1104 = vmatpush3.bf16.msra.mxu1 %v1210_v0 }
  0x64   :  { %1105 = vmatprep.subr.bf16.mxu1 %v1300_v58 }
  0x65   :  { %1061 = vmatpush3.bf16.msra.mxu0 %v1201_v55 }
  0x66   :  { %1111 = vmatprep.subr.bf16.mxu0 %v1300_v58 }
  0x67   :  { %1106 = vmatpush3.bf16.msra.mxu1 %v1211_v1 }
  0x68   :  { %588 = vmatmul.mubr.bf16.vlgmr.msra.gmra.mrb[4].mxu0 %v928_v56  ;;  %1123 = vmatprep.subr.bf16.mxu1 %v1300_v58 }
  0x69   :  { %1119 = vmatprep.mubr.msk.bf16.mxu0 %vm1301_vm0, %v1300_v58  ;;  %1112 = vmatpush3.bf16.msra.mxu0 %v1212_v2 }
  0x6a   :  { %1113 = vmatprep.subr.bf16.mxu0 %v1300_v58 }
  0x6d   :  { %1114 = vmatpush3.bf16.msra.mxu0 %v1213_v3 }
  0x6e   :  { %1115 = vmatprep.subr.bf16.mxu0 %v1300_v58 }
  0x71   :  { %1116 = vmatpush3.bf16.msra.mxu0 %v1214_v25 }
  0x72   :  { %1117 = vmatprep.subr.bf16.mxu0 %v1300_v58 }
  0x75   :  { %1118 = vmatpush3.bf16.msra.mxu0 %v1215_v26 }
 0x11b   :  { %v1018_v4 = vpop.f32.mrb[0].mxu0 }
 0x11c   :  { %v1019_v6 = vpop.f32.mrb[1].mxu0 }
 0x11d   :  { %v1020_v7 = vadd.f32 %v1019_v6, %v1018_v4  ;;  %v1021_v8 = vpop.f32.mrb[2].mxu0  ;;  %v1040_v9 = vpop.f32.mrb[0].mxu1 }
 0x11e   :  { %v1022_v10 = vpop.f32.mrb[3].mxu0  ;;  %v1041_v11 = vpop.f32.mrb[1].mxu1 }
 0x11f   :  { %v510_v12 = vadd.f32 %v1020_v7, %v923_v5  ;;  %v1042_v13 = vadd.f32 %v1041_v11, %v1040_v9  ;;  %v1043_v14 = vpop.f32.mrb[2].mxu1 }
 0x120   :  { %v1044_v15 = vpop.f32.mrb[3].mxu1 }
 0x121   :  { %v550_v16 = vadd.f32 %v1042_v13, %v510_v12 }
 0x13b   :  { %v1062_v17 = vpop.f32.mrb[4].mxu0 }
 0x13c   :  { %v1063_v18 = vpop.f32.mrb[5].mxu0 }
 0x13d   :  { %v1064_v19 = vadd.f32 %v1063_v18, %v1062_v17  ;;  %v1065_v20 = vpop.f32.mrb[6].mxu0 }
 0x13e   :  { %v1066_v21 = vpop.f32.mrb[7].mxu0 }
 0x13f   :  { %v590_v22 = vadd.f32 %v1064_v19, %v550_v16 }
 0x141   :  { %v595_v23 = vmax.f32 %v590_v22, 0.0 }
 0x143   :  { %v596_v24 = vpack.c.bf16 %v595_v23, %v595_v23 }
 0x145   :  { %1108 = vmatmul.mubr.bf16.vlgmr.msra.gmra.mrb[4].mxu1 %v596_v24 }
 0x146   :  { %1139 = vmatprep.mubr.msk.bf16.mxu1 %vm1301_vm0, %v1300_v58  ;;  %1124 = vmatpush3.bf16.msra.mxu1 %v1216_v27 }
 0x147   :  { %1125 = vmatprep.subr.bf16.mxu1 %v1300_v58 }
 0x14a   :  { %1126 = vmatpush3.bf16.msra.mxu1 %v1217_v28 }
 0x14b   :  { %1127 = vmatprep.subr.bf16.mxu1 %v1300_v58 }
 0x14e   :  { %1128 = vmatpush3.bf16.msra.mxu1 %v1218_v29 }
 0x14f   :  { %1129 = vmatprep.subr.bf16.mxu1 %v1300_v58 }
 0x152   :  { %1130 = vmatpush3.bf16.msra.mxu1 %v1219_v30 }
 0x153   :  { %1131 = vmatprep.subr.bf16.mxu1 %v1300_v58 }
 0x156   :  { %1132 = vmatpush3.bf16.msra.mxu1 %v1220_v31 }
 0x157   :  { %1133 = vmatprep.subr.bf16.mxu1 %v1300_v58 }
 0x15a   :  { %1134 = vmatpush3.bf16.msra.mxu1 %v1221_v32 }
 0x15b   :  { %1135 = vmatprep.subr.bf16.mxu1 %v1300_v58 }
 0x15e   :  { %1136 = vmatpush3.bf16.msra.mxu1 %v1222_v41 }
 0x15f   :  { %1137 = vmatprep.subr.bf16.mxu1 %v1300_v58 }
 0x162   :  { %1138 = vmatpush3.bf16.msra.mxu1 %v1223_v42 }
 0x218   :  { %v702_v34 = vpop.f32.mrb[4].mxu1 }
 0x219   :  { %v703_v35 = vadd.f32 %v978_v33, %v702_v34  ;;  %v1109_v36 = vpop.f32.mrb[5].mxu1 }
 0x21a   :  { %v705_v37 = vpop.f32.mrb[6].mxu1 }
 0x21b   :  { %v708_v38 = vmax.f32 %v703_v35, 0.0  ;;  %v1110_v39 = vpop.f32.mrb[7].mxu1 }
 0x21d   :  { %v709_v40 = vpack.c.bf16 %v708_v38, %v708_v38 }
 0x21f   :  { %1120 = vmatmul.mubr.msk.bf16.vlgmr.msra.gmra.mrb[8].mxu0 %vm749_vm1, %v709_v40 }
 0x2f2   :  { %v787_v44 = vpop.f32.mrb[8].mxu0 }
 0x2f3   :  { %v788_v45 = vadd.f32 %v987_v43, %v787_v44  ;;  %v1121_v46 = vpop.f32.mrb[9].mxu0 }
 0x2f4   :  { %v790_v47 = vpop.f32.mrb[10].mxu0 }
 0x2f5   :  { %v793_v48 = vmax.f32 %v788_v45, 0.0  ;;  %v1122_v49 = vpop.f32.mrb[11].mxu0 }
 0x2f7   :  { %v794_v50 = vpack.c.bf16 %v793_v48, %v793_v48 }
 0x2f9   :  { %1140 = vmatmul.mubr.bf16.vlgmr.msra.gmra.mrb[8].mxu1 %v794_v50 }
 0x3cc   :  { %v900_v52 = vpop.f32.mrb[8].mxu1 }
 0x3cd   :  { %v901_v53 = vadd.f32 %v993_v51, %v900_v52  ;;  %v1141_v54 = vpop.f32.mrb[9].mxu1 }
 0x3ce   :  { %v903_v55 = vpop.f32.mrb[10].mxu1 }
 0x3cf   :  { %906 = vst [vmem:[#allocation7] sm:$0xff] %v901_v53  ;;  %v1142_v56 = vpop.f32.mrb[11].mxu1 }
 0x3d0   :  { %1279 = shalt.err (!%p1276_p6)
}
 0x3d1   :  { %s1280_s8 = scalar_lea.hbm %s1502_s9, 128 }
 0x3d2   :  { %p1281_p7 = scmp.ne.s32.totalorder %s1502_s9, %s1280_s8  ;;  %p1284_p8 = scmp.lt.u32.totalorder %s1280_s8, %s1502_s9 }
 0x3d4   :  { %p1286_p9 = pnand %p1284_p8, %p1281_p7 }
 0x3d6   :  { %1289 = shalt.err (!%p1286_p9)
}
 0x3d7   :  { %916 = dma.vmem_to_hbm [thread:$0]  %s914_s14, 128, %s1502_s9, [#allocation4]  }
 0x3d8   :  { %1294 = dma.done.wait [#allocation4], 128  }
 0x3d9   :  { %1295 = vsyncadd [#allocation4], 4294967168 }
 0x3da   :  { %920 = vsyncpa [#allocation3], 1 }
 0x3db   :  { %921 = vsyncpa [#allocation6], 1 }
 0x3dc   :  { %922 = vsyncpa [#allocation4], 1 }

</bundles_post_ra>
